<compile_context>
chip_gen: v7x
topology: tpu7x:2x2x1
jax: 0.10.0
libtpu: 0.0.40
codegen_flags: <defaults>
</compile_context>

<pallas_src>
import functools

import jax
import jax.numpy as jnp
from jax import lax
from jax.experimental import pallas as pl
from jax.experimental.pallas import tpu as pltpu

LANES = 128
MAX_ROW_TILE = 512  # 512 rows x 128 lanes = 65536 boxes / ~1 MiB f32 per input block


def _loss_tile(p, t, loss_type, xyxy):
    """p, t: (4, R, L) f32 coordinate planes -> (R, L) per-box loss."""
    p = p.astype(jnp.float32)
    t = t.astype(jnp.float32)

    if xyxy:
        p_tl_x, p_tl_y, p_br_x, p_br_y = p[0], p[1], p[2], p[3]
        t_tl_x, t_tl_y, t_br_x, t_br_y = t[0], t[1], t[2], t[3]
        area_p = (p[2] - p[0]) * (p[3] - p[1])
        area_g = (t[2] - t[0]) * (t[3] - t[1])
    else:
        # cxcywh -> corner candidates (computed once, reused for tl/br and c_tl/c_br)
        p_hw, p_hh = p[2] * 0.5, p[3] * 0.5
        t_hw, t_hh = t[2] * 0.5, t[3] * 0.5
        p_tl_x, p_tl_y = p[0] - p_hw, p[1] - p_hh
        p_br_x, p_br_y = p[0] + p_hw, p[1] + p_hh
        t_tl_x, t_tl_y = t[0] - t_hw, t[1] - t_hh
        t_br_x, t_br_y = t[0] + t_hw, t[1] + t_hh
        area_p = p[2] * p[3]
        area_g = t[2] * t[3]

    tl_x = jnp.maximum(p_tl_x, t_tl_x)
    tl_y = jnp.maximum(p_tl_y, t_tl_y)
    br_x = jnp.minimum(p_br_x, t_br_x)
    br_y = jnp.minimum(p_br_y, t_br_y)

    w = jnp.maximum(br_x - tl_x, 0.0)
    h = jnp.maximum(br_y - tl_y, 0.0)
    area_i = w * h

    iou = area_i * pl.reciprocal(area_p + area_g - area_i + 1e-16, approx=False)

    if loss_type == "iou":
        loss = 1.0 - iou * iou
    elif loss_type == "giou":
        c_tl_x = jnp.minimum(p_tl_x, t_tl_x)
        c_tl_y = jnp.minimum(p_tl_y, t_tl_y)
        c_br_x = jnp.maximum(p_br_x, t_br_x)
        c_br_y = jnp.maximum(p_br_y, t_br_y)
        area_c = (c_br_x - c_tl_x) * (c_br_y - c_tl_y)
        giou = iou - (area_c - area_i) * pl.reciprocal(
            jnp.maximum(area_c, 1e-16), approx=False)
        loss = 1.0 - jnp.clip(giou, -1.0, 1.0)
    else:
        raise ValueError(f"unknown loss_type {loss_type}")
    return loss


def _iou_loss_kernel(pred_ref, tgt_ref, out_ref, *, loss_type, xyxy):
    # pred_ref / tgt_ref: (4, R_TILE, LANES), out_ref: (R_TILE, LANES)
    out_ref[...] = _loss_tile(pred_ref[...], tgt_ref[...], loss_type, xyxy)


def _iou_loss_reduce_kernel(pred_ref, tgt_ref, out_ref, *,
                            loss_type, xyxy, n, r_tile, lanes):
    # Fused sum over valid boxes; out_ref is a (1, 1) resident accumulator.
    i = pl.program_id(0)
    loss = _loss_tile(pred_ref[...], tgt_ref[...], loss_type, xyxy)

    base = i * (r_tile * lanes)
    row = lax.broadcasted_iota(jnp.int32, (r_tile, lanes), 0)
    lane = lax.broadcasted_iota(jnp.int32, (r_tile, lanes), 1)
    idx = base + row * lanes + lane
    partial = jnp.sum(jnp.where(idx < n, loss, 0.0))

    @pl.when(i == 0)
    def _():
        out_ref[...] = jnp.zeros_like(out_ref)

    out_ref[...] = out_ref[...] + partial


def iou_loss(pred, target, *, reduction="none", loss_type="iou", xyxy=False):
    """Pallas-backed equivalent of IOUloss.forward."""
    assert pred.shape[0] == target.shape[0]
    pred = pred.reshape(-1, 4)
    target = target.reshape(-1, 4)
    n = pred.shape[0]

    rows = pl.cdiv(n, LANES)
    r_tile = min(MAX_ROW_TILE, ((rows + 7) // 8) * 8)  # multiple of 8, capped
    rows_pad = pl.cdiv(rows, r_tile) * r_tile
    n_pad = rows_pad * LANES
    grid = (rows_pad // r_tile,)

    def to_planes(x):
        # (N, 4) -> (4, N) -> pad -> (4, rows_pad, LANES).  Single transpose+pad
        # that XLA fuses; each coordinate becomes a dense (sublane, lane) plane.
        xt = jnp.pad(x.astype(jnp.float32).T, ((0, 0), (0, n_pad - n)))
        return xt.reshape(4, rows_pad, LANES)

    pred_p = to_planes(pred)
    tgt_p = to_planes(target)

    in_specs = [
        pl.BlockSpec((4, r_tile, LANES), lambda i: (0, i, 0)),
        pl.BlockSpec((4, r_tile, LANES), lambda i: (0, i, 0)),
    ]

    if reduction == "none":
        kernel = functools.partial(_iou_loss_kernel, loss_type=loss_type, xyxy=xyxy)
        out = pl.pallas_call(
            kernel,
            out_shape=jax.ShapeDtypeStruct((rows_pad, LANES), jnp.float32),
            grid=grid,
            in_specs=in_specs,
            out_specs=pl.BlockSpec((r_tile, LANES), lambda i: (i, 0)),
            compiler_params=pltpu.CompilerParams(
                dimension_semantics=("parallel",)),
        )(pred_p, tgt_p)
        return out.reshape(-1)[:n]

    # Fused 'sum' / 'mean': single scalar output, padded lanes masked in-kernel.
    kernel = functools.partial(
        _iou_loss_reduce_kernel, loss_type=loss_type, xyxy=xyxy,
        n=n, r_tile=r_tile, lanes=LANES)
    total = pl.pallas_call(
        kernel,
        out_shape=jax.ShapeDtypeStruct((1, 1), jnp.float32),
        grid=grid,
        in_specs=in_specs,
        out_specs=pl.BlockSpec((1, 1), lambda i: (0, 0)),
        compiler_params=pltpu.CompilerParams(
            dimension_semantics=("arbitrary",)),
    )(pred_p, tgt_p)[0, 0]

    if reduction == "mean":
        total = total / n
    return total


def _iou_loss_ref(pred, target, *, reduction="none", loss_type="iou", xyxy=False):
    """Pure-jnp reference mirroring the PyTorch module."""
    pred = pred.reshape(-1, 4).astype(jnp.float32)
    target = target.reshape(-1, 4).astype(jnp.float32)
    if xyxy:
        tl = jnp.maximum(pred[:, :2], target[:, :2])
        br = jnp.minimum(pred[:, 2:], target[:, 2:])
        area_p = jnp.prod(pred[:, 2:] - pred[:, :2], axis=1)
        area_g = jnp.prod(target[:, 2:] - target[:, :2], axis=1)
    else:
        tl = jnp.maximum(pred[:, :2] - pred[:, 2:] / 2, target[:, :2] - target[:, 2:] / 2)
        br = jnp.minimum(pred[:, :2] + pred[:, 2:] / 2, target[:, :2] + target[:, 2:] / 2)
        area_p = jnp.prod(pred[:, 2:], axis=1)
        area_g = jnp.prod(target[:, 2:], axis=1)
    hw = jnp.maximum(br - tl, 0.0)
    area_i = jnp.prod(hw, axis=1)
    iou = area_i / (area_p + area_g - area_i + 1e-16)
    if loss_type == "iou":
        loss = 1 - iou ** 2
    else:
        if xyxy:
            c_tl = jnp.minimum(pred[:, :2], target[:, :2])
            c_br = jnp.maximum(pred[:, 2:], target[:, 2:])
        else:
            c_tl = jnp.minimum(pred[:, :2] - pred[:, 2:] / 2, target[:, :2] - target[:, 2:] / 2)
            c_br = jnp.maximum(pred[:, :2] + pred[:, 2:] / 2, target[:, :2] + target[:, 2:] / 2)
        area_c = jnp.prod(c_br - c_tl, axis=1)
        giou = iou - (area_c - area_i) / jnp.maximum(area_c, 1e-16)
        loss = 1 - jnp.clip(giou, -1.0, 1.0)
    if reduction == "mean":
        loss = loss.mean()
    elif reduction == "sum":
        loss = loss.sum()
    return loss


def _make_boxes(key, shape_prefix):
    k1, k2, k3, k4 = jax.random.split(key, 4)
    pred_xy = jax.random.normal(k1, shape_prefix + (2,), jnp.float32) * 4.0
    pred_wh = jnp.abs(jax.random.normal(k2, shape_prefix + (2,), jnp.float32)) * 2.0 + 0.5
    tgt_xy = pred_xy + jax.random.normal(k3, shape_prefix + (2,), jnp.float32) * 0.5
    tgt_wh = jnp.abs(jax.random.normal(k4, shape_prefix + (2,), jnp.float32)) * 2.0 + 0.5
    pred = jnp.concatenate([pred_xy, pred_wh], axis=-1)
    target = jnp.concatenate([tgt_xy, tgt_wh], axis=-1)
    return pred, target


if __name__ == "__main__":
    key = jax.random.PRNGKey(0)
    k_small, k_big = jax.random.split(key)

    # Small YOLO-like case: (batch=2, anchors=8, 4) boxes in cxcywh format.
    cases = [
        _make_boxes(k_small, (2, 8)),
        # Ragged case (N=300) to exercise padding / in-kernel mask for reductions.
        _make_boxes(k_big, (300,)),
    ]

    ok = True
    for pred, target in cases:
        for loss_type in ("iou", "giou"):
            for xyxy in (False, True):
                for reduction in ("none", "mean", "sum"):
                    out = iou_loss(pred, target, reduction=reduction,
                                   loss_type=loss_type, xyxy=xyxy)
                    out = jax.block_until_ready(out)
                    ref = _iou_loss_ref(pred, target, reduction=reduction,
                                        loss_type=loss_type, xyxy=xyxy)
                    if not jnp.allclose(out, ref, rtol=1e-5, atol=1e-5):
                        ok = False

    if not ok:
        raise SystemExit("mismatch vs reference")
    print("KERNEL_OK")
</pallas_src>

<mosaic_0001>
module attributes {stable_mosaic.version = 11 : i64} {
  func.func @_iou_loss_kernel(%arg0: i32, %arg1: memref<4x8x128xf32, #tpu.memory_space<vmem>>, %arg2: memref<4x8x128xf32, #tpu.memory_space<vmem>>, %arg3: memref<8x128xf32, #tpu.memory_space<vmem>>) attributes {dimension_semantics = [#tpu.dimension_semantics<parallel>], iteration_bounds = array<i64: 1>, scalar_prefetch = 0 : i64, scratch_operands = 0 : i64, tpu.core_type = #tpu.core_type<tc>, window_params = [{transform_indices = @transform_0, window_bounds = array<i64: 4, 8, 128>}, {transform_indices = @transform_1, window_bounds = array<i64: 4, 8, 128>}, {transform_indices = @transform_2, window_bounds = array<i64: 8, 128>}]} {
    %c0 = arith.constant 0 : index
    %c0_0 = arith.constant 0 : index
    %c0_1 = arith.constant 0 : index
    %0 = vector.load %arg1[%c0, %c0_0, %c0_1] : memref<4x8x128xf32, #tpu.memory_space<vmem>>, vector<4x8x128xf32>
    %c0_2 = arith.constant 0 : index
    %c0_3 = arith.constant 0 : index
    %c0_4 = arith.constant 0 : index
    %1 = vector.load %arg2[%c0_2, %c0_3, %c0_4] : memref<4x8x128xf32, #tpu.memory_space<vmem>>, vector<4x8x128xf32>
    %2 = vector.extract_strided_slice %0 {offsets = [2, 0, 0], sizes = [1, 8, 128], strides = [1, 1, 1]} : vector<4x8x128xf32> to vector<1x8x128xf32>
    %3 = vector.shape_cast %2 : vector<1x8x128xf32> to vector<8x128xf32>
    %cst = arith.constant 5.000000e-01 : f32
    %4 = vector.broadcast %cst : f32 to vector<8x128xf32>
    %5 = arith.mulf %3, %4 : vector<8x128xf32>
    %6 = vector.extract_strided_slice %0 {offsets = [3, 0, 0], sizes = [1, 8, 128], strides = [1, 1, 1]} : vector<4x8x128xf32> to vector<1x8x128xf32>
    %7 = vector.shape_cast %6 : vector<1x8x128xf32> to vector<8x128xf32>
    %cst_5 = arith.constant 5.000000e-01 : f32
    %8 = vector.broadcast %cst_5 : f32 to vector<8x128xf32>
    %9 = arith.mulf %7, %8 : vector<8x128xf32>
    %10 = vector.extract_strided_slice %1 {offsets = [2, 0, 0], sizes = [1, 8, 128], strides = [1, 1, 1]} : vector<4x8x128xf32> to vector<1x8x128xf32>
    %11 = vector.shape_cast %10 : vector<1x8x128xf32> to vector<8x128xf32>
    %cst_6 = arith.constant 5.000000e-01 : f32
    %12 = vector.broadcast %cst_6 : f32 to vector<8x128xf32>
    %13 = arith.mulf %11, %12 : vector<8x128xf32>
    %14 = vector.extract_strided_slice %1 {offsets = [3, 0, 0], sizes = [1, 8, 128], strides = [1, 1, 1]} : vector<4x8x128xf32> to vector<1x8x128xf32>
    %15 = vector.shape_cast %14 : vector<1x8x128xf32> to vector<8x128xf32>
    %cst_7 = arith.constant 5.000000e-01 : f32
    %16 = vector.broadcast %cst_7 : f32 to vector<8x128xf32>
    %17 = arith.mulf %15, %16 : vector<8x128xf32>
    %18 = vector.extract_strided_slice %0 {offsets = [0, 0, 0], sizes = [1, 8, 128], strides = [1, 1, 1]} : vector<4x8x128xf32> to vector<1x8x128xf32>
    %19 = vector.shape_cast %18 : vector<1x8x128xf32> to vector<8x128xf32>
    %20 = arith.subf %19, %5 : vector<8x128xf32>
    %21 = vector.extract_strided_slice %0 {offsets = [1, 0, 0], sizes = [1, 8, 128], strides = [1, 1, 1]} : vector<4x8x128xf32> to vector<1x8x128xf32>
    %22 = vector.shape_cast %21 : vector<1x8x128xf32> to vector<8x128xf32>
    %23 = arith.subf %22, %9 : vector<8x128xf32>
    %24 = vector.extract_strided_slice %0 {offsets = [0, 0, 0], sizes = [1, 8, 128], strides = [1, 1, 1]} : vector<4x8x128xf32> to vector<1x8x128xf32>
    %25 = vector.shape_cast %24 : vector<1x8x128xf32> to vector<8x128xf32>
    %26 = arith.addf %25, %5 : vector<8x128xf32>
    %27 = vector.extract_strided_slice %0 {offsets = [1, 0, 0], sizes = [1, 8, 128], strides = [1, 1, 1]} : vector<4x8x128xf32> to vector<1x8x128xf32>
    %28 = vector.shape_cast %27 : vector<1x8x128xf32> to vector<8x128xf32>
    %29 = arith.addf %28, %9 : vector<8x128xf32>
    %30 = vector.extract_strided_slice %1 {offsets = [0, 0, 0], sizes = [1, 8, 128], strides = [1, 1, 1]} : vector<4x8x128xf32> to vector<1x8x128xf32>
    %31 = vector.shape_cast %30 : vector<1x8x128xf32> to vector<8x128xf32>
    %32 = arith.subf %31, %13 : vector<8x128xf32>
    %33 = vector.extract_strided_slice %1 {offsets = [1, 0, 0], sizes = [1, 8, 128], strides = [1, 1, 1]} : vector<4x8x128xf32> to vector<1x8x128xf32>
    %34 = vector.shape_cast %33 : vector<1x8x128xf32> to vector<8x128xf32>
    %35 = arith.subf %34, %17 : vector<8x128xf32>
    %36 = vector.extract_strided_slice %1 {offsets = [0, 0, 0], sizes = [1, 8, 128], strides = [1, 1, 1]} : vector<4x8x128xf32> to vector<1x8x128xf32>
    %37 = vector.shape_cast %36 : vector<1x8x128xf32> to vector<8x128xf32>
    %38 = arith.addf %37, %13 : vector<8x128xf32>
    %39 = vector.extract_strided_slice %1 {offsets = [1, 0, 0], sizes = [1, 8, 128], strides = [1, 1, 1]} : vector<4x8x128xf32> to vector<1x8x128xf32>
    %40 = vector.shape_cast %39 : vector<1x8x128xf32> to vector<8x128xf32>
    %41 = arith.addf %40, %17 : vector<8x128xf32>
    %42 = vector.extract_strided_slice %0 {offsets = [2, 0, 0], sizes = [1, 8, 128], strides = [1, 1, 1]} : vector<4x8x128xf32> to vector<1x8x128xf32>
    %43 = vector.shape_cast %42 : vector<1x8x128xf32> to vector<8x128xf32>
    %44 = vector.extract_strided_slice %0 {offsets = [3, 0, 0], sizes = [1, 8, 128], strides = [1, 1, 1]} : vector<4x8x128xf32> to vector<1x8x128xf32>
    %45 = vector.shape_cast %44 : vector<1x8x128xf32> to vector<8x128xf32>
    %46 = arith.mulf %43, %45 : vector<8x128xf32>
    %47 = vector.extract_strided_slice %1 {offsets = [2, 0, 0], sizes = [1, 8, 128], strides = [1, 1, 1]} : vector<4x8x128xf32> to vector<1x8x128xf32>
    %48 = vector.shape_cast %47 : vector<1x8x128xf32> to vector<8x128xf32>
    %49 = vector.extract_strided_slice %1 {offsets = [3, 0, 0], sizes = [1, 8, 128], strides = [1, 1, 1]} : vector<4x8x128xf32> to vector<1x8x128xf32>
    %50 = vector.shape_cast %49 : vector<1x8x128xf32> to vector<8x128xf32>
    %51 = arith.mulf %48, %50 : vector<8x128xf32>
    %52 = arith.maximumf %20, %32 : vector<8x128xf32>
    %53 = arith.maximumf %23, %35 : vector<8x128xf32>
    %54 = arith.minimumf %26, %38 : vector<8x128xf32>
    %55 = arith.minimumf %29, %41 : vector<8x128xf32>
    %56 = arith.subf %54, %52 : vector<8x128xf32>
    %cst_8 = arith.constant 0.000000e+00 : f32
    %57 = vector.broadcast %cst_8 : f32 to vector<8x128xf32>
    %58 = arith.maximumf %56, %57 : vector<8x128xf32>
    %59 = arith.subf %55, %53 : vector<8x128xf32>
    %cst_9 = arith.constant 0.000000e+00 : f32
    %60 = vector.broadcast %cst_9 : f32 to vector<8x128xf32>
    %61 = arith.maximumf %59, %60 : vector<8x128xf32>
    %62 = arith.mulf %58, %61 : vector<8x128xf32>
    %63 = arith.addf %46, %51 : vector<8x128xf32>
    %64 = arith.subf %63, %62 : vector<8x128xf32>
    %cst_10 = arith.constant 1.000000e-16 : f32
    %65 = vector.broadcast %cst_10 : f32 to vector<8x128xf32>
    %66 = arith.addf %64, %65 : vector<8x128xf32>
    %67 = tpu.reciprocal %66 : vector<8x128xf32> -> vector<8x128xf32>
    %68 = arith.mulf %62, %67 : vector<8x128xf32>
    %69 = arith.mulf %68, %68 : vector<8x128xf32>
    %cst_11 = arith.constant 1.000000e+00 : f32
    %70 = vector.broadcast %cst_11 : f32 to vector<8x128xf32>
    %71 = arith.subf %70, %69 : vector<8x128xf32>
    %c0_12 = arith.constant 0 : index
    %c0_13 = arith.constant 0 : index
    %72 = vector.load %arg3[%c0_12, %c0_13] : memref<8x128xf32, #tpu.memory_space<vmem>>, vector<8x128xf32>
    tpu.vector_store %arg3[%c0_12, %c0_13], %71 {strides = array<i32>} : memref<8x128xf32, #tpu.memory_space<vmem>>, vector<8x128xf32>,
    return
  }
  func.func @transform_0(%arg0: i32) -> (i32, i32, i32) {
    %c0_i32 = arith.constant 0 : i32
    %c0_i32_0 = arith.constant 0 : i32
    %c0_i32_1 = arith.constant 0 : i32
    return %c0_i32, %arg0, %c0_i32_0 : i32, i32, i32
  }
  func.func @transform_1(%arg0: i32) -> (i32, i32, i32) {
    %c0_i32 = arith.constant 0 : i32
    %c0_i32_0 = arith.constant 0 : i32
    %c0_i32_1 = arith.constant 0 : i32
    return %c0_i32, %arg0, %c0_i32_0 : i32, i32, i32
  }
  func.func @transform_2(%arg0: i32) -> (i32, i32) {
    %c0_i32 = arith.constant 0 : i32
    %c0_i32_0 = arith.constant 0 : i32
    return %arg0, %c0_i32 : i32, i32
  }
}

</mosaic_0001>

<bundles_post_ra>
// kernel: tpu_custom_call.1
= control target key start
LH: loop header
LB: loop body
LE: loop exit
PB: predicated region body
PF: predicated region fallthrough
CT: control target
= control target key end

     0   :  { %7 = vsyncpa [#allocation3], 0  ;;  %s230_s0 = inlined_call_operand.hbm [shape: f32[4,8,128], index: 0, kind: input, shape index: {}]   ;;  %s231_s1 = inlined_call_operand.hbm [shape: f32[4,8,128], index: 1, kind: input, shape index: {}]   ;;  %s232_s2 = inlined_call_operand.hbm [shape: f32[8,128], index: 2, kind: output, shape index: {}]  }
   0x1   :  { %8 = vsyncpa [#allocation6], 0 }
   0x2   :  { %9 = vsyncpa [#allocation4], 0  ;;  %s174_s9 = smov [#allocation2]   ;;  %s102_s13 = scalar_lea.hbm %s230_s0, 512 }
   0x3   :  { %s15_s10 = sshll.u32 %s174_s9, 4  ;;  %p103_p0 = scmp.ne.s32.totalorder %s230_s0, %s102_s13  ;;  %s16_s10 = int_to_ptr.vmem [resolvable:$true] %s15_s10 }
   0x4   :  { %p106_p1 = scmp.lt.u32.totalorder %s102_s13, %s230_s0 }
   0x6   :  { %p108_p2 = pnand %p106_p1, %p103_p0 }
   0x8   :  { %111 = shalt.err (!%p108_p2)
}
   0x9   :  { %s112_s18 = scalar_lea.vmem %s16_s10, 512  ;;  %p117_p4 = scmp.lt.s32.totalorder %s16_s10, %s16_s10 }
   0xa   :  { %p113_p3 = scmp.ne.s32.totalorder %s16_s10, %s112_s18  ;;  %p118_p5 = scmp.lt.s32.totalorder %s112_s18, %s112_s18 }
   0xc   :  { %p119_p6 = por %p118_p5, %p117_p4 }
   0xe   :  { %p120_p7 = pnand %p119_p6, %p113_p3 }
  0x10   :  { %123 = shalt.err (!%p120_p7)
}
  0x11   :  { %s175_s19 = smov 128   ;;  %s176_s20 = smov 8  }
  0x12   :  { %21 = dma.hbm_to_vmem [thread:$0]  %s230_s0, 512, %s16_s10, [#allocation3], %s175_s19, %s175_s19, %s176_s20  }
  0x13   :  { %s177_s23 = smov [#allocation5]   ;;  %s124_s27 = scalar_lea.hbm %s231_s1, 512 }
  0x14   :  { %s27_s24 = sshll.u32 %s177_s23, 4  ;;  %p125_p8 = scmp.ne.s32.totalorder %s231_s1, %s124_s27  ;;  %s28_s24 = int_to_ptr.vmem [resolvable:$true] %s27_s24 }
  0x15   :  { %p128_p9 = scmp.lt.u32.totalorder %s124_s27, %s231_s1 }
  0x17   :  { %p130_p10 = pnand %p128_p9, %p125_p8 }
  0x19   :  { %133 = shalt.err (!%p130_p10)
}
  0x1a   :  { %s134_s4 = scalar_lea.vmem %s28_s24, 512  ;;  %p139_p12 = scmp.lt.s32.totalorder %s28_s24, %s28_s24 }
  0x1b   :  { %p135_p11 = scmp.ne.s32.totalorder %s28_s24, %s134_s4  ;;  %p140_p13 = scmp.lt.s32.totalorder %s134_s4, %s134_s4 }
  0x1d   :  { %p141_p0 = por %p140_p13, %p139_p12 }
  0x1f   :  { %p142_p1 = pnand %p141_p0, %p135_p11 }
  0x21   :  { %145 = shalt.err (!%p142_p1)
}
  0x22   :  { %33 = dma.hbm_to_vmem [thread:$0]  %s231_s1, 512, %s28_s24, [#allocation6], %s175_s19, %s175_s19, %s176_s20  }
  0x23   :  { %168 = dma.done.wait [#allocation3], 512  }
  0x24   :  { %169 = vsyncadd [#allocation3], 4294966784 }
  0x25   :  { %170 = dma.done.wait [#allocation6], 512  }
  0x26   :  { %171 = vsyncadd [#allocation6], 4294966784  ;;  %v40_v0 = vld [vmem:[#allocation2] sm:$0xff]  ;;  %v42_v1 = vld [vmem:[#allocation2 + $0x10] sm:$0xff]  ;;  %s178_s1 = smov [#allocation7]  }
  0x27   :  { %v41_v2 = vld [vmem:[#allocation2 + $0x8] sm:$0xff]  ;;  %v43_v3 = vld [vmem:[#allocation2 + $0x18] sm:$0xff]  ;;  %v44_v4 = vld [vmem:[#allocation5] sm:$0xff]  ;;  %v48_v5 = vmul.f32 0.5, %v42_v1  ;;  %s85_s6 = sshll.u32 %s178_s1, 4  ;;  %s86_s6 = int_to_ptr.vmem [resolvable:$true] %s85_s6 }
  0x28   :  { %v45_v6 = vld [vmem:[#allocation5 + $0x8] sm:$0xff]  ;;  %v46_v7 = vld [vmem:[#allocation5 + $0x10] sm:$0xff]  ;;  %v47_v8 = vld [vmem:[#allocation5 + $0x18] sm:$0xff]  ;;  %v49_v9 = vmul.f32 0.5, %v43_v3  ;;  %v60_v20 = vmul.f32 %v43_v3, %v42_v1  ;;  %s146_s7 = scalar_lea.vmem %s86_s6, 128  ;;  %p151_p3 = scmp.lt.s32.totalorder %s86_s6, %s86_s6 }
  0x29   :  { %v50_v10 = vmul.f32 0.5, %v46_v7  ;;  %v51_v11 = vmul.f32 0.5, %v47_v8  ;;  %v52_v12 = vsub.f32 %v40_v0, %v48_v5  ;;  %v54_v13 = vadd.f32 %v48_v5, %v40_v0  ;;  %p147_p2 = scmp.ne.s32.totalorder %s86_s6, %s146_s7  ;;  %p152_p4 = scmp.lt.s32.totalorder %s146_s7, %s146_s7 }
  0x2a   :  { %v53_v14 = vsub.f32 %v41_v2, %v49_v9  ;;  %v55_v15 = vadd.f32 %v49_v9, %v41_v2  ;;  %v61_v21 = vmul.f32 %v47_v8, %v46_v7 }
  0x2b   :  { %v56_v16 = vsub.f32 %v44_v4, %v50_v10  ;;  %v57_v17 = vsub.f32 %v45_v6, %v51_v11  ;;  %v58_v18 = vadd.f32 %v50_v10, %v44_v4  ;;  %v59_v19 = vadd.f32 %v51_v11, %v45_v6  ;;  %p153_p5 = por %p152_p4, %p151_p3 }
  0x2c   :  { %v71_v30 = vadd.f32 %v61_v21, %v60_v20 }
  0x2d   :  { %v62_v22 = vmax.f32 %v52_v12, %v56_v16  ;;  %v63_v23 = vmax.f32 %v53_v14, %v57_v17  ;;  %v64_v24 = vmin.f32 %v54_v13, %v58_v18  ;;  %v65_v25 = vmin.f32 %v55_v15, %v59_v19  ;;  %p154_p6 = pnand %p153_p5, %p147_p2 }
  0x2f   :  { %v66_v26 = vsub.f32 %v64_v24, %v62_v22  ;;  %v68_v27 = vsub.f32 %v65_v25, %v63_v23 }
  0x31   :  { %v67_v28 = vmax.f32 %v66_v26, 0.0  ;;  %v69_v29 = vmax.f32 %v68_v27, 0.0 }
  0x33   :  { %v70_v31 = vmul.f32 %v69_v29, %v67_v28 }
  0x35   :  { %v72_v32 = vsub.f32 %v71_v30, %v70_v31 }
  0x37   :  { %v73_v33 = vadd.f32 1e-16, %v72_v32 }
  0x39   :  { %100 = vrcp.f32 %v73_v33 }
  0x43   :  { %v101_v34 = vpop.eup %100 }
  0x44   :  { %v75_v35 = vmul.f32 %v101_v34, %v70_v31 }
  0x46   :  { %v76_v36 = vmul.f32 %v75_v35, %v75_v35 }
  0x48   :  { %v77_v37 = vsub.f32 1.0, %v76_v36 }
  0x4a   :  { %78 = vst [vmem:[#allocation7] sm:$0xff] %v77_v37 }
  0x4b   :  { %157 = shalt.err (!%p154_p6)
}
  0x4c   :  { %s158_s10 = scalar_lea.hbm %s232_s2, 128 }
  0x4d   :  { %p159_p7 = scmp.ne.s32.totalorder %s232_s2, %s158_s10  ;;  %p162_p8 = scmp.lt.u32.totalorder %s158_s10, %s232_s2 }
  0x4f   :  { %p164_p9 = pnand %p162_p8, %p159_p7 }
  0x51   :  { %167 = shalt.err (!%p164_p9)
}
  0x52   :  { %88 = dma.vmem_to_hbm [thread:$0]  %s86_s6, 128, %s232_s2, [#allocation4]  }
  0x53   :  { %172 = dma.done.wait [#allocation4], 128  }
  0x54   :  { %173 = vsyncadd [#allocation4], 4294967168 }
  0x55   :  { %92 = vsyncpa [#allocation3], 1 }
  0x56   :  { %93 = vsyncpa [#allocation6], 1 }
  0x57   :  { %94 = vsyncpa [#allocation4], 1 }

</bundles_post_ra>
